<compile_context>
chip_gen: v7x
topology: tpu7x:2x2x1
jax: 0.10.0
libtpu: 0.0.40
codegen_flags: <defaults>
</compile_context>

<pallas_src>
import functools

import jax
import jax.numpy as jnp
import numpy as np
from jax import lax
from jax.experimental import pallas as pl
from jax.experimental.pallas import tpu as pltpu


# -----------------------------------------------------------------------------
# Kernel: matmuls only (width upsample, vertical upsample+tap shift, conv tap).
# One grid step per batch block; everything stays in VMEM.
# -----------------------------------------------------------------------------
def _upsample_conv_kernel(x_ref, ucol_ref, dk_ref, w2_ref, b2_ref, o_ref, *, k):
    f32 = jnp.float32

    # Width nearest-upsample (block-diagonal over channels):
    #   (bb*H, Cin*W) @ (Cin*W, Cin*Wu) -> (bb*H, Cin*Wu)   [lane-dense from here on]
    colup = jnp.dot(x_ref[...].astype(f32), ucol_ref[...],
                    preferred_element_type=f32)

    acc = None
    for ky in range(k):                                      # static unroll (k small)
        # Vertical upsample + tap shift + zero pad (precomputed 0/1 operator):
        #   (bb*Hu, bb*H) @ (bb*H, Cin*Wu) -> (bb*Hu, Cin*Wu)
        shifted = jnp.dot(dk_ref[ky], colup, preferred_element_type=f32)
        # One fused conv matmul per vertical tap (all input channels + all
        # horizontal taps folded into the widened weight):
        #   (bb*Hu, Cin*Wu) @ (Cin*Wu, Wu*Cout) -> (bb*Hu, Wu*Cout)
        tap = jnp.dot(shifted, w2_ref[ky], preferred_element_type=f32)
        acc = tap if acc is None else acc + tap

    # Bias added once; (bb*Hu, Wu*Cout) lane-dense (unmasked) store.
    o_ref[...] = (acc + b2_ref[...]).astype(o_ref.dtype)


# -----------------------------------------------------------------------------
# Factory: precompute all static operators (numpy, once) and return a jitted
# forward.  NCHW in / NCHW out (PyTorch convention).
# -----------------------------------------------------------------------------
def build_upsample_conv(conv_w, conv_b, x_shape):
    n, cin, h, w = x_shape
    cout, cin_w, k, k2 = conv_w.shape
    assert cin_w == cin and k == k2 and k % 2 == 1, "odd kernel, matching channels"
    p = (k - 1) // 2
    hu, wu = 2 * h, 2 * w

    # Batch block: amortize per-grid-step overhead but keep >= 2 grid steps so
    # v7x's two TensorCores both get work ("parallel" batch axis).
    bb = 1
    for cand in range(2, n + 1):
        if n % cand == 0 and n // cand >= 2 and cand * hu <= 256:
            bb = cand

    # ---------------- host-side (numpy) precompute, hoisted out of jit -------
    wnp = np.asarray(conv_w, np.float32)                     # (Cout, Cin, K, K)
    bnp = np.asarray(conv_b, np.float32)                     # (Cout,)

    # Width nearest-upsample, block-diagonal over channels: (Cin*W, Cin*Wu)
    ucol = np.zeros((cin * w, cin * wu), np.float32)
    c_idx = np.repeat(np.arange(cin), wu)
    xu_idx = np.tile(np.arange(wu), cin)
    ucol[c_idx * w + xu_idx // 2, c_idx * wu + xu_idx] = 1.0

    # Per-ky vertical upsample + tap shift (+ zero pad), block-diagonal over the
    # bb samples of a block: (K, bb*Hu, bb*H)
    dk = np.zeros((k, bb * hu, bb * h), np.float32)
    for ky in range(k):
        for y in range(hu):
            u = y + ky - p                                   # unpadded upsampled row
            if 0 <= u < hu:
                for b in range(bb):
                    dk[ky, b * hu + y, b * h + u // 2] = 1.0

    # Per-ky widened weight (horizontal taps + horizontal zero pad folded in):
    #   w2[ky, c*Wu + xs, X*Cout + o] = W[o, c, ky, xs - X + p]  if 0<=xs-X+p<K
    xs = np.arange(wu)
    kx = xs[:, None] - xs[None, :] + p                       # (Wu, Wu)
    valid = (kx >= 0) & (kx < k)
    kxc = np.clip(kx, 0, k - 1)
    wt = np.transpose(wnp, (1, 2, 3, 0))                     # (Cin, K, K, Cout)
    g = wt[:, :, kxc, :]                                     # (Cin, K, Wu, Wu, Cout)
    g = np.where(valid[None, None, :, :, None], g, 0.0)
    w2 = np.ascontiguousarray(np.transpose(g, (1, 0, 2, 3, 4))
                              ).reshape(k, cin * wu, wu * cout)

    b2 = np.tile(bnp, wu).reshape(1, wu * cout)              # bias tiled over X

    ucol_j, dk_j, w2_j, b2_j = map(jnp.asarray, (ucol, dk, w2, b2))

    call = pl.pallas_call(
        functools.partial(_upsample_conv_kernel, k=k),
        out_shape=jax.ShapeDtypeStruct((n * hu, wu * cout), jnp.float32),
        grid=(n // bb,),
        in_specs=[
            pl.BlockSpec((bb * h, cin * w), lambda i: (i, 0)),            # x block
            pl.BlockSpec((cin * w, cin * wu), lambda i: (0, 0)),          # ucol
            pl.BlockSpec((k, bb * hu, bb * h), lambda i: (0, 0, 0)),      # dk
            pl.BlockSpec((k, cin * wu, wu * cout), lambda i: (0, 0, 0)),  # w2
            pl.BlockSpec((1, wu * cout), lambda i: (0, 0)),               # b2
        ],
        out_specs=pl.BlockSpec((bb * hu, wu * cout), lambda i: (i, 0)),
        compiler_params=pltpu.CompilerParams(dimension_semantics=("parallel",)),
    )

    @jax.jit
    def forward(x):
        # NCHW -> (N*H, Cin*W): rows = (n, h), lanes = (c, x).
        xr = jnp.transpose(x, (0, 2, 1, 3)).reshape(n * h, cin * w).astype(jnp.float32)
        out = call(xr, ucol_j, dk_j, w2_j, b2_j)
        # (N*Hu, Wu*Cout) -> (N, Cout, Hu, Wu): tiny reshape + transpose.
        return jnp.transpose(out.reshape(n, hu, wu, cout), (0, 3, 1, 2)).astype(x.dtype)

    return forward


# -----------------------------------------------------------------------------
# Pure-JAX reference (NCHW) for verification.
# -----------------------------------------------------------------------------
def upsample_conv_ref(x, conv_w, conv_b):
    k = conv_w.shape[2]
    p = (k - 1) // 2
    up = jnp.repeat(jnp.repeat(x, 2, axis=2), 2, axis=3)     # nearest 2x (== cat x4 + D2S)
    out = lax.conv_general_dilated(
        up.astype(jnp.float32), conv_w.astype(jnp.float32), (1, 1),
        [(p, p), (p, p)], dimension_numbers=("NCHW", "OIHW", "NCHW"))
    return out + conv_b.reshape(1, -1, 1, 1)


if __name__ == "__main__":
    N, CIN, COUT, HW, K = 2, 4, 4, 16, 3   # input_dim=4, output_dim=4, kernel_size=3

    key = jax.random.PRNGKey(0)
    k0, k1, k2 = jax.random.split(key, 3)
    x = jax.random.normal(k0, (N, CIN, HW, HW), dtype=jnp.float32)
    conv_w = 0.2 * jax.random.normal(k1, (COUT, CIN, K, K), dtype=jnp.float32)
    conv_b = 0.1 * jax.random.normal(k2, (COUT,), dtype=jnp.float32)

    fwd = build_upsample_conv(conv_w, conv_b, x.shape)
    out = jax.block_until_ready(fwd(x))

    ref = jax.block_until_ready(upsample_conv_ref(x, conv_w, conv_b))
    np.testing.assert_allclose(np.asarray(out), np.asarray(ref), rtol=2e-3, atol=2e-3)
    assert out.shape == (N, COUT, 2 * HW, 2 * HW)

    print("KERNEL_OK")
</pallas_src>

<mosaic_0001>
module attributes {stable_mosaic.version = 11 : i64} {
  func.func @_upsample_conv_kernel(%arg0: i32, %arg1: memref<16x64xf32, #tpu.memory_space<vmem>>, %arg2: memref<64x128xf32, #tpu.memory_space<vmem>>, %arg3: memref<3x32x16xf32, #tpu.memory_space<vmem>>, %arg4: memref<3x128x128xf32, #tpu.memory_space<vmem>>, %arg5: memref<1x128xf32, #tpu.memory_space<vmem>>, %arg6: memref<32x128xf32, #tpu.memory_space<vmem>>) attributes {dimension_semantics = [#tpu.dimension_semantics<parallel>], iteration_bounds = array<i64: 2>, scalar_prefetch = 0 : i64, scratch_operands = 0 : i64, tpu.core_type = #tpu.core_type<tc>, window_params = [{transform_indices = @transform_0, window_bounds = array<i64: 16, 64>}, {pipeline_mode = #tpu.pipeline_mode<synchronous>, transform_indices = @transform_1, window_bounds = array<i64: 64, 128>}, {pipeline_mode = #tpu.pipeline_mode<synchronous>, transform_indices = @transform_2, window_bounds = array<i64: 3, 32, 16>}, {pipeline_mode = #tpu.pipeline_mode<synchronous>, transform_indices = @transform_3, window_bounds = array<i64: 3, 128, 128>}, {pipeline_mode = #tpu.pipeline_mode<synchronous>, transform_indices = @transform_4, window_bounds = array<i64: 1, 128>}, {transform_indices = @transform_5, window_bounds = array<i64: 32, 128>}]} {
    %c0 = arith.constant 0 : index
    %c0_0 = arith.constant 0 : index
    %0 = vector.load %arg1[%c0, %c0_0] : memref<16x64xf32, #tpu.memory_space<vmem>>, vector<16x64xf32>
    %c0_1 = arith.constant 0 : index
    %c0_2 = arith.constant 0 : index
    %1 = vector.load %arg2[%c0_1, %c0_2] : memref<64x128xf32, #tpu.memory_space<vmem>>, vector<64x128xf32>
    %cst = arith.constant dense<0.000000e+00> : vector<16x128xf32>
    %2 = tpu.matmul %0, %1, %cst {dimension_numbers = #tpu.dot_dimension_numbers<[1], [0], [0], [1], [0, 0, 1, 1], [], []>} : vector<16x64xf32>, vector<64x128xf32>, vector<16x128xf32> -> vector<16x128xf32>
    %c0_3 = arith.constant 0 : index
    %c0_4 = arith.constant 0 : index
    %c0_5 = arith.constant 0 : index
    %3 = vector.load %arg3[%c0_3, %c0_4, %c0_5] : memref<3x32x16xf32, #tpu.memory_space<vmem>>, vector<1x32x16xf32>
    %4 = vector.shape_cast %3 : vector<1x32x16xf32> to vector<32x16xf32>
    %cst_6 = arith.constant dense<0.000000e+00> : vector<32x128xf32>
    %5 = tpu.matmul %4, %2, %cst_6 {dimension_numbers = #tpu.dot_dimension_numbers<[1], [0], [0], [1], [0, 0, 1, 1], [], []>} : vector<32x16xf32>, vector<16x128xf32>, vector<32x128xf32> -> vector<32x128xf32>
    %c0_7 = arith.constant 0 : index
    %c0_8 = arith.constant 0 : index
    %c0_9 = arith.constant 0 : index
    %6 = vector.load %arg4[%c0_7, %c0_8, %c0_9] : memref<3x128x128xf32, #tpu.memory_space<vmem>>, vector<1x128x128xf32>
    %7 = vector.shape_cast %6 : vector<1x128x128xf32> to vector<128x128xf32>
    %cst_10 = arith.constant dense<0.000000e+00> : vector<32x128xf32>
    %8 = tpu.matmul %5, %7, %cst_10 {dimension_numbers = #tpu.dot_dimension_numbers<[1], [0], [0], [1], [0, 0, 1, 1], [], []>} : vector<32x128xf32>, vector<128x128xf32>, vector<32x128xf32> -> vector<32x128xf32>
    %c1 = arith.constant 1 : index
    %c0_11 = arith.constant 0 : index
    %c0_12 = arith.constant 0 : index
    %9 = vector.load %arg3[%c1, %c0_11, %c0_12] : memref<3x32x16xf32, #tpu.memory_space<vmem>>, vector<1x32x16xf32>
    %10 = vector.shape_cast %9 : vector<1x32x16xf32> to vector<32x16xf32>
    %cst_13 = arith.constant dense<0.000000e+00> : vector<32x128xf32>
    %11 = tpu.matmul %10, %2, %cst_13 {dimension_numbers = #tpu.dot_dimension_numbers<[1], [0], [0], [1], [0, 0, 1, 1], [], []>} : vector<32x16xf32>, vector<16x128xf32>, vector<32x128xf32> -> vector<32x128xf32>
    %c1_14 = arith.constant 1 : index
    %c0_15 = arith.constant 0 : index
    %c0_16 = arith.constant 0 : index
    %12 = vector.load %arg4[%c1_14, %c0_15, %c0_16] : memref<3x128x128xf32, #tpu.memory_space<vmem>>, vector<1x128x128xf32>
    %13 = vector.shape_cast %12 : vector<1x128x128xf32> to vector<128x128xf32>
    %cst_17 = arith.constant dense<0.000000e+00> : vector<32x128xf32>
    %14 = tpu.matmul %11, %13, %cst_17 {dimension_numbers = #tpu.dot_dimension_numbers<[1], [0], [0], [1], [0, 0, 1, 1], [], []>} : vector<32x128xf32>, vector<128x128xf32>, vector<32x128xf32> -> vector<32x128xf32>
    %15 = arith.addf %8, %14 : vector<32x128xf32>
    %c2 = arith.constant 2 : index
    %c0_18 = arith.constant 0 : index
    %c0_19 = arith.constant 0 : index
    %16 = vector.load %arg3[%c2, %c0_18, %c0_19] : memref<3x32x16xf32, #tpu.memory_space<vmem>>, vector<1x32x16xf32>
    %17 = vector.shape_cast %16 : vector<1x32x16xf32> to vector<32x16xf32>
    %cst_20 = arith.constant dense<0.000000e+00> : vector<32x128xf32>
    %18 = tpu.matmul %17, %2, %cst_20 {dimension_numbers = #tpu.dot_dimension_numbers<[1], [0], [0], [1], [0, 0, 1, 1], [], []>} : vector<32x16xf32>, vector<16x128xf32>, vector<32x128xf32> -> vector<32x128xf32>
    %c2_21 = arith.constant 2 : index
    %c0_22 = arith.constant 0 : index
    %c0_23 = arith.constant 0 : index
    %19 = vector.load %arg4[%c2_21, %c0_22, %c0_23] : memref<3x128x128xf32, #tpu.memory_space<vmem>>, vector<1x128x128xf32>
    %20 = vector.shape_cast %19 : vector<1x128x128xf32> to vector<128x128xf32>
    %cst_24 = arith.constant dense<0.000000e+00> : vector<32x128xf32>
    %21 = tpu.matmul %18, %20, %cst_24 {dimension_numbers = #tpu.dot_dimension_numbers<[1], [0], [0], [1], [0, 0, 1, 1], [], []>} : vector<32x128xf32>, vector<128x128xf32>, vector<32x128xf32> -> vector<32x128xf32>
    %22 = arith.addf %15, %21 : vector<32x128xf32>
    %c0_25 = arith.constant 0 : index
    %c0_26 = arith.constant 0 : index
    %23 = vector.load %arg5[%c0_25, %c0_26] : memref<1x128xf32, #tpu.memory_space<vmem>>, vector<1x128xf32>
    %24 = vector.broadcast %23 : vector<1x128xf32> to vector<32x128xf32>
    %25 = arith.addf %22, %24 : vector<32x128xf32>
    %c0_27 = arith.constant 0 : index
    %c0_28 = arith.constant 0 : index
    %26 = vector.load %arg6[%c0_27, %c0_28] : memref<32x128xf32, #tpu.memory_space<vmem>>, vector<32x128xf32>
    tpu.vector_store %arg6[%c0_27, %c0_28], %25 {strides = array<i32>} : memref<32x128xf32, #tpu.memory_space<vmem>>, vector<32x128xf32>,
    return
  }
  func.func @transform_0(%arg0: i32) -> (i32, i32) {
    %c0_i32 = arith.constant 0 : i32
    %c0_i32_0 = arith.constant 0 : i32
    return %arg0, %c0_i32 : i32, i32
  }
  func.func @transform_1(%arg0: i32) -> (i32, i32) {
    %c0_i32 = arith.constant 0 : i32
    %c0_i32_0 = arith.constant 0 : i32
    %c0_i32_1 = arith.constant 0 : i32
    return %c0_i32, %c0_i32_0 : i32, i32
  }
  func.func @transform_2(%arg0: i32) -> (i32, i32, i32) {
    %c0_i32 = arith.constant 0 : i32
    %c0_i32_0 = arith.constant 0 : i32
    %c0_i32_1 = arith.constant 0 : i32
    %c0_i32_2 = arith.constant 0 : i32
    return %c0_i32, %c0_i32_0, %c0_i32_1 : i32, i32, i32
  }
  func.func @transform_3(%arg0: i32) -> (i32, i32, i32) {
    %c0_i32 = arith.constant 0 : i32
    %c0_i32_0 = arith.constant 0 : i32
    %c0_i32_1 = arith.constant 0 : i32
    %c0_i32_2 = arith.constant 0 : i32
    return %c0_i32, %c0_i32_0, %c0_i32_1 : i32, i32, i32
  }
  func.func @transform_4(%arg0: i32) -> (i32, i32) {
    %c0_i32 = arith.constant 0 : i32
    %c0_i32_0 = arith.constant 0 : i32
    %c0_i32_1 = arith.constant 0 : i32
    return %c0_i32, %c0_i32_0 : i32, i32
  }
  func.func @transform_5(%arg0: i32) -> (i32, i32) {
    %c0_i32 = arith.constant 0 : i32
    %c0_i32_0 = arith.constant 0 : i32
    return %arg0, %c0_i32 : i32, i32
  }
}

</mosaic_0001>

<bundles_post_ra>
// kernel: forward.1
= control target key start
LH: loop header
LB: loop body
LE: loop exit
PB: predicated region body
PF: predicated region fallthrough
CT: control target
= control target key end

     0   :  { %10 = vsyncpa [#allocation3], 0  ;;  %s1902_s0 = inlined_call_operand.vmem [shape: f32[32,64], index: 0, kind: input, shape index: {}]   ;;  %s1903_s1 = inlined_call_operand.hbm [shape: f32[64,128], index: 1, kind: input, shape index: {}]   ;;  %s1904_s2 = inlined_call_operand.hbm [shape: f32[3,32,16], index: 2, kind: input, shape index: {}]   ;;  %s1905_s3 = inlined_call_operand.vmem [shape: f32[3,128,128], index: 3, kind: input, shape index: {}]   ;;  %s1906_s4 = inlined_call_operand.vmem [shape: f32[1,128], index: 4, kind: input, shape index: {}]   ;;  %s1907_s5 = inlined_call_operand.vmem [shape: f32[64,128], index: 5, kind: output, shape index: {}]  }
   0x1   :  { %11 = vsyncpa [#allocation5], 0  ;;  %s1640_s18 = smov 0  }
   0x2 LB: > { %s1646_s19 = sadd.s32 4294967295, %s1604_s18   ;;  %p1060_p0 = scmp.ge.s32.totalorder %s1604_s18, 1  ;;  %s1604_s18 = sphi %s1640_s18, %s17_s18  }
   0x3   : > { %p158_p1 = scmp.lt.s32.totalorder %s1604_s18, 3  ;;  %s1606_s20 = smov [#allocation2]  }
   0x4   : > { %s170_s21 = sshll.u32 %s1606_s20, 4  ;;  %p1908_p3 = scmp.eq.s32.totalorder %s1646_s19, 0  ;;  %s171_s21 = int_to_ptr.vmem [resolvable:$true] %s170_s21 }
   0x5   : > { %p1650_p2 = pnand %p1060_p0, %p158_p1  ;;  %s1607_s23 = smov [#allocation4]  }
   0x6   : > { %s183_s24 = sshll.u32 %s1607_s23, 4  ;;  %s1534_s28 = scalar_lea.hbm %s1903_s1, 1024  ;;  %s1663_s24 = int_to_ptr.vmem [resolvable:$true] %s183_s24 }
   0x7   : > { %s1910_s22 = scalar_select %p1650_p2, 1, 0 }
   0x8   : > { %p1511_p4 = pneg %p1650_p2  ;;  %p1535_p6 = scmp.ne.s32.totalorder %s1903_s1, %s1534_s28 }
   0x9   : > { %p1541_p10 = scmp.lt.u32.totalorder %s1534_s28, %s1903_s1 }
   0xa   : > { %p1659_p5 = pnand %p1908_p3, %p1511_p4 }
   0xc   : > { %p1536_p7 = pneg %p1659_p5 }
   0xe   : > { %p1537_p8 = pnand %p1536_p7, %p1535_p6 }
  0x10   : > { %p1538_p9 = pneg %p1537_p8 }
  0x12   : > { %p1543_p11 = pnand %p1541_p10, %p1538_p9 }
  0x14   : > { %1546 = shalt.err (!%p1543_p11)
}
  0x15   : > { %s1547_s8 = scalar_lea.vmem %s171_s21, 1024  ;;  %p1555_p1 = scmp.lt.s32.totalorder %s171_s21, %s171_s21 }
  0x16   : > { %p1548_p12 = scmp.ne.s32.totalorder %s171_s21, %s1547_s8  ;;  %p1556_p4 = scmp.lt.s32.totalorder %s1547_s8, %s1547_s8 }
  0x18   : > { %p1550_p13 = pnand %p1548_p12, %p1536_p7  ;;  %p1557_p3 = por %p1556_p4, %p1555_p1 }
  0x1a   : > { %p1551_p0 = pneg %p1550_p13 }
  0x1c   : > { %p1558_p2 = pnand %p1557_p3, %p1551_p0 }
  0x1e   : > { %1561 = shalt.err (!%p1558_p2)
}
  0x1f   : > { %s1608_s9 = smov 128   ;;  %s1609_s10 = smov 8  }
  0x20   : > { %1514 = dma.hbm_to_vmem [thread:$0]  (!%p1659_p5), %s1903_s1, 1024, %s171_s21, [#allocation3], %s1608_s9, %s1608_s9, %s1609_s10  }
  0x21   : > { %s1562_s15 = scalar_lea.hbm %s1904_s2, 1536 }
  0x22   : > { %p1563_p6 = scmp.ne.s32.totalorder %s1904_s2, %s1562_s15  ;;  %p1569_p8 = scmp.lt.u32.totalorder %s1562_s15, %s1904_s2 }
  0x24   : > { %p1565_p2 = pnand %p1563_p6, %p1536_p7 }
  0x26   : > { %p1566_p3 = pneg %p1565_p2 }
  0x28   : > { %p1571_p9 = pnand %p1569_p8, %p1566_p3 }
  0x2a   : > { %1574 = shalt.err (!%p1571_p9)
}
  0x2b   : > { %s1575_s21 = scalar_lea.vmem %s1663_s24, 1536  ;;  %p1583_p13 = scmp.lt.s32.totalorder %s1663_s24, %s1663_s24 }
  0x2c   : > { %p1576_p10 = scmp.ne.s32.totalorder %s1663_s24, %s1575_s21  ;;  %p1584_p0 = scmp.lt.s32.totalorder %s1575_s21, %s1575_s21 }
  0x2e   : > { %p1578_p11 = pnand %p1576_p10, %p1536_p7  ;;  %p1585_p1 = por %p1584_p0, %p1583_p13 }
  0x30   : > { %p1579_p12 = pneg %p1578_p11 }
  0x32   : > { %p1586_p4 = pnand %p1585_p1, %p1579_p12 }
  0x34   : > { %1589 = shalt.err (!%p1586_p4)
}
  0x35   : > { %1517 = dma.hbm_to_vmem [thread:$0]  (!%p1659_p5), %s1904_s2, 1536, %s1663_s24, [#allocation5], %s1608_s9, %s1608_s9, %s1609_s10  }
  0x36   : > { %p1912_p6 = scmp.ne.s32.totalorder %s1910_s22, 0 }
  0x37   : > { %p1913_p2 = scmp.eq.s32.totalorder (!%p1912_p6), %s1646_s19, 0 }
  0x38   : > { %214 = sbr.rel (%p1912_p6) target bundleno = 963 (0x3c3), region = 40 }
  0x3f   : > { %1595 = dma.done.wait (%p1913_p2), [#allocation3], 1024   ;;  %p1914_p7 = pmov %p1913_p2 }
  0x40   : > { %p1915_p3 = pmov %p1913_p2 }
  0x41   : > { %1597 = vsyncadd (%p1914_p7), [#allocation3], 4294966272 }
  0x42   : > { %1599 = dma.done.wait (%p1915_p3), [#allocation5], 1536   ;;  %p1916_p8 = pmov %p1913_p2 }
  0x43   : > { %s1067_s25 = sshll.u32 %s1646_s19, 1  ;;  %v260_v0 = vld [vmem:[#allocation2] sm:$0xff]  ;;  %v261_v1 = vld [vmem:[#allocation2 + $0x8] sm:$0xff]  ;;  %v262_v2 = vld [vmem:[#allocation2 + $0x10] sm:$0xff]  ;;  %vm268_vm0 = vcmask 523264   ;;  %vm354_vm1 = vcmask 130048  }
  0x44   : > { %1601 = vsyncadd (%p1916_p8), [#allocation5], 4294965760  ;;  %p247_p9 = scmp.lt.s32.totalorder %s1067_s25, 3  ;;  %v1371_v3 = vpack.c.bf16 %v261_v1, %v260_v0  ;;  %v263_v4 = vld [vmem:[#allocation2 + $0x18] sm:$0xff]  ;;  %v264_v6 = vld [vmem:[#allocation2 + $0x20] sm:$0xff]  ;;  %s1069_s9 = sshll.u32 %s1646_s19, 2 }
  0x45   : > { %v1375_v5 = vpack.c.bf16 %v263_v4, %v262_v2  ;;  %v265_v7 = vld [vmem:[#allocation2 + $0x28] sm:$0xff]  ;;  %v266_v10 = vld [vmem:[#allocation2 + $0x30] sm:$0xff]  ;;  %v267_v11 = vld [vmem:[#allocation2 + $0x38] sm:$0xff]  ;;  %p253_p5 = scmp.lt.s32.totalorder %s1069_s9, 7 }
  0x46   : > { %s1918_s25 = smov (!%p247_p9, %s1067_s25), 3  ;;  %1372 = vmatprep.subr.bf16.mxu0 %v1371_v3  ;;  %v1379_v9 = vpack.c.bf16 %v265_v7, %v264_v6  ;;  %v1383_v12 = vpack.c.bf16 %v267_v11, %v266_v10  ;;  %v469_v14 = vld [vmem:[#allocation4 + $0x20] sm:$0xff]  ;;  %v1082_v17 = vld [vmem:[%s1905_s3 + $0x88] sm:$0xff]  ;;  %v1083_v22 = vld [vmem:[%s1905_s3 + $0x90] sm:$0xff] }
  0x47   : > { %s1068_s24 = sshll.u32 %s1918_s25, 3  ;;  %1374 = vmatpush3.bf16.msra.mxu0 %v1371_v3  ;;  %v350_v15 = vld [vmem:[#allocation4] sm:$0xff]  ;;  %1241 = vmatprep.mubr.msk.f32.mxu1 %vm354_vm1, %v469_v14  ;;  %v1084_v23 = vld [vmem:[%s1905_s3 + $0x98] sm:$0xff]  ;;  %v470_v24 = vld [vmem:[#allocation4 + $0x28] sm:$0xff]  ;;  %s1920_s9 = smov (!%p253_p5, %s1069_s9), 7 }
  0x48   : > { %s250_s29 = scalar_lea.vmem %s1902_s0, %s1068_s24  ;;  %1376 = vmatprep.subr.bf16.mxu0 %v1375_v5  ;;  %v1081_v16 = vld [vmem:[%s1905_s3 + $0x80] sm:$0xff]  ;;  %v351_v25 = vld [vmem:[#allocation4 + $0x8] sm:$0xff]  ;;  %v471_v26 = vld [vmem:[#allocation4 + $0x30] sm:$0xff]  ;;  %v1399_v27 = vpack.c.bf16 %v1084_v23, %v1083_v22  ;;  %s1070_s10 = sshll.u32 %s1920_s9, 3 }
  0x49   : > { %v258_v8 = vld [vmem:[%s250_s29] sm:$0xff]  ;;  %v259_v13 = vld [vmem:[%s250_s29 + $0x8] sm:$0xff]  ;;  %v1395_v21 = vpack.c.bf16 %v1082_v17, %v1081_v16  ;;  %v352_v30 = vld [vmem:[#allocation4 + $0x10] sm:$0xff]  ;;  %s256_s15 = scalar_lea.vmem %s1907_s5, %s1070_s10 }
  0x4a   : > { %1224 = vmatprep.mubr.msk.f32.mxu0 %vm268_vm0, %v258_v8  ;;  %v1085_v28 = vld [vmem:[%s1905_s3 + $0xa0] sm:$0xff]  ;;  %v1086_v29 = vld [vmem:[%s1905_s3 + $0xa8] sm:$0xff]  ;;  %v472_v31 = vld [vmem:[#allocation4 + $0x38] sm:$0xff] }
  0x4b   : > { %1378 = vmatpush3.bf16.msra.mxu0 %v1375_v5  ;;  %v353_v32 = vld [vmem:[#allocation4 + $0x18] sm:$0xff]  ;;  %v1403_v33 = vpack.c.bf16 %v1086_v29, %v1085_v28  ;;  %v1087_v34 = vld [vmem:[%s1905_s3 + $0xb0] sm:$0xff]  ;;  %v1089_v37 = vld [vmem:[%s1905_s3 + $0xc0] sm:$0xff] }
  0x4c   : > { %1380 = vmatprep.subr.bf16.mxu0 %v1379_v9  ;;  %v1088_v35 = vld [vmem:[%s1905_s3 + $0xb8] sm:$0xff]  ;;  %v1090_v38 = vld [vmem:[%s1905_s3 + $0xc8] sm:$0xff]  ;;  %v1091_v40 = vld [vmem:[%s1905_s3 + $0xd0] sm:$0xff] }
  0x4d   : > { %v1407_v36 = vpack.c.bf16 %v1088_v35, %v1087_v34  ;;  %v1411_v39 = vpack.c.bf16 %v1090_v38, %v1089_v37  ;;  %v1092_v41 = vld [vmem:[%s1905_s3 + $0xd8] sm:$0xff]  ;;  %v1093_v43 = vld [vmem:[%s1905_s3 + $0xe0] sm:$0xff]  ;;  %v1094_v44 = vld [vmem:[%s1905_s3 + $0xe8] sm:$0xff] }
  0x4e   : > { %v1415_v42 = vpack.c.bf16 %v1092_v41, %v1091_v40  ;;  %v1419_v45 = vpack.c.bf16 %v1094_v44, %v1093_v43  ;;  %v1095_v46 = vld [vmem:[%s1905_s3 + $0xf0] sm:$0xff]  ;;  %v1096_v47 = vld [vmem:[%s1905_s3 + $0xf8] sm:$0xff]  ;;  %v452_v49 = vld [vmem:[%s1905_s3] sm:$0xff] }
  0x4f   : > { %1382 = vmatpush3.bf16.msra.mxu0 %v1379_v9  ;;  %v1423_v48 = vpack.c.bf16 %v1096_v47, %v1095_v46  ;;  %v453_v50 = vld [vmem:[%s1905_s3 + $0x8] sm:$0xff]  ;;  %v454_v51 = vld [vmem:[%s1905_s3 + $0x10] sm:$0xff]  ;;  %v455_v53 = vld [vmem:[%s1905_s3 + $0x18] sm:$0xff] }
  0x50   : > { %1384 = vmatprep.subr.bf16.mxu0 %v1383_v12  ;;  %v1427_v52 = vpack.c.bf16 %v453_v50, %v452_v49  ;;  %v1431_v54 = vpack.c.bf16 %v455_v53, %v454_v51  ;;  %v456_v55 = vld [vmem:[%s1905_s3 + $0x20] sm:$0xff]  ;;  %v457_v56 = vld [vmem:[%s1905_s3 + $0x28] sm:$0xff]  ;;  %v458_v58 = vld [vmem:[%s1905_s3 + $0x30] sm:$0xff] }
  0x51   : > { %v1435_v57 = vpack.c.bf16 %v457_v56, %v456_v55  ;;  %v459_v59 = vld [vmem:[%s1905_s3 + $0x38] sm:$0xff]  ;;  %v460_v61 = vld [vmem:[%s1905_s3 + $0x40] sm:$0xff]  ;;  %v461_v62 = vld [vmem:[%s1905_s3 + $0x48] sm:$0xff] }
  0x52   : > { %v1439_v60 = vpack.c.bf16 %v459_v59, %v458_v58  ;;  %v1443_v63 = vpack.c.bf16 %v461_v62, %v460_v61  ;;  %v462_v0 = vld [vmem:[%s1905_s3 + $0x50] sm:$0xff]  ;;  %v463_v1 = vld [vmem:[%s1905_s3 + $0x58] sm:$0xff]  ;;  %v464_v3 = vld [vmem:[%s1905_s3 + $0x60] sm:$0xff] }
  0x53   : > { %1386 = vmatpush3.bf16.msra.mxu0 %v1383_v12  ;;  %v1447_v2 = vpack.c.bf16 %v463_v1, %v462_v0  ;;  %v465_v4 = vld [vmem:[%s1905_s3 + $0x68] sm:$0xff]  ;;  %v466_v6 = vld [vmem:[%s1905_s3 + $0x70] sm:$0xff]  ;;  %v467_v7 = vld [vmem:[%s1905_s3 + $0x78] sm:$0xff] }
  0x54   : > { %v1451_v5 = vpack.c.bf16 %v465_v4, %v464_v3  ;;  %v1455_v8 = vpack.c.bf16 %v467_v7, %v466_v6  ;;  %v1101_v9 = vld [vmem:[%s1905_s3 + $0x100] sm:$0xff]  ;;  %v1102_v10 = vld [vmem:[%s1905_s3 + $0x108] sm:$0xff]  ;;  %v1103_v12 = vld [vmem:[%s1905_s3 + $0x110] sm:$0xff] }
  0x55   : > { %v1463_v11 = vpack.c.bf16 %v1102_v10, %v1101_v9  ;;  %v1107_v28 = vld [vmem:[%s1905_s3 + $0x130] sm:$0xff]  ;;  %v1108_v29 = vld [vmem:[%s1905_s3 + $0x138] sm:$0xff]  ;;  %v1114_v40 = vld [vmem:[%s1905_s3 + $0x168] sm:$0xff] }
  0x56   : > { %1225 = vmatmul.mubr.msk.f32.vlgmr.msra.gmra.mrb[0].mxu0 %vm268_vm0, %v259_v13  ;;  %v1104_v13 = vld [vmem:[%s1905_s3 + $0x118] sm:$0xff]  ;;  %v1117_v55 = vld [vmem:[%s1906_s4] ss:$0 sm:$0xff] }
  0x57   : > { %1231 = vmatprep.mubr.msk.f32.mxu0 %vm354_vm1, %v350_v15  ;;  %v761_v34 = vld [vmem:[#allocation4 + $0x58] sm:$0xff] }
  0x58   : > { %v1112_v37 = vld [vmem:[%s1905_s3 + $0x158] sm:$0xff] }
  0x59   : > { %v1116_v43 = vld [vmem:[%s1905_s3 + $0x178] sm:$0xff] }
 0x129   : > { %v1226_v18 = vpop.f32.mrb[0].mxu0 }
 0x12a   : > { %v341_v19 = vpop.f32.mrb[1].mxu0 }
 0x12b   : > { %v1736_v20 = vpack.c.bf16 %v1226_v18, %v341_v19  ;;  %v1467_v18 = vpack.c.bf16 %v1104_v13, %v1103_v12  ;;  %v1105_v19 = vld [vmem:[%s1905_s3 + $0x120] sm:$0xff] }
 0x12d   : > { %1388 = vmatprep.subr.bf16.mxu0 %v1736_v20  ;;  %1392 = vmatprep.subr.bf16.mxu1 %v1736_v20 }
 0x12e   : > { %1390 = vmatpush3.bf16.msra.mxu0 %v1736_v20  ;;  %1394 = vmatpush3.bf16.msra.mxu1 %v1736_v20 }
 0x12f   : > { %1396 = vmatprep.subr.bf16.mxu0 %v1395_v21  ;;  %1428 = vmatprep.subr.bf16.mxu1 %v1427_v52 }
 0x131   : > { %1242 = vmatmul.mubr.msk.f32.vlgmr.msra.gmra.mrb[0].mxu1 %vm354_vm1, %v470_v24  ;;  %1232 = vmatmul.mubr.msk.f32.vlgmr.msra.gmra.mrb[2].mxu0 %vm354_vm1, %v351_v25  ;;  %v758_v25 = vld [vmem:[#allocation4 + $0x40] sm:$0xff] }
 0x132   : > { %1398 = vmatpush3.bf16.msra.mxu0 %v1395_v21  ;;  %1244 = vmatprep.mubr.msk.f32.mxu1 %vm354_vm1, %v471_v26  ;;  %v1106_v21 = vld [vmem:[%s1905_s3 + $0x128] sm:$0xff] }
 0x133   : > { %1400 = vmatprep.subr.bf16.mxu0 %v1399_v27  ;;  %1234 = vmatprep.mubr.msk.f32.mxu0 %vm354_vm1, %v352_v30  ;;  %v1471_v26 = vpack.c.bf16 %v1106_v21, %v1105_v19  ;;  %v760_v30 = vld [vmem:[#allocation4 + $0x50] sm:$0xff] }
 0x134   : > { %1430 = vmatpush3.bf16.msra.mxu1 %v1427_v52 }
 0x135   : > { %1245 = vmatmul.mubr.msk.f32.gmra.mrb[2].mxu1 %vm354_vm1, %v472_v31  ;;  %1235 = vmatmul.mubr.msk.f32.gmra.mrb[4].mxu0 %vm354_vm1, %v353_v32  ;;  %v1475_v31 = vpack.c.bf16 %v1108_v29, %v1107_v28  ;;  %v1109_v32 = vld [vmem:[%s1905_s3 + $0x140] sm:$0xff] }
 0x136   : > { %1402 = vmatpush3.bf16.msra.mxu0 %v1399_v27  ;;  %1432 = vmatprep.subr.bf16.mxu1 %v1431_v54 }
 0x137   : > { %1404 = vmatprep.subr.bf16.mxu0 %v1403_v33 }
 0x138   : > { %1434 = vmatpush3.bf16.msra.mxu1 %v1431_v54 }
 0x139   : > { %1436 = vmatprep.subr.bf16.mxu1 %v1435_v57 }
 0x13a   : > { %1406 = vmatpush3.bf16.msra.mxu0 %v1403_v33  ;;  %v1110_v33 = vld [vmem:[%s1905_s3 + $0x148] sm:$0xff] }
 0x13b   : > { %1408 = vmatprep.subr.bf16.mxu0 %v1407_v36  ;;  %v1479_v35 = vpack.c.bf16 %v1110_v33, %v1109_v32 }
 0x13c   : > { %1438 = vmatpush3.bf16.msra.mxu1 %v1435_v57 }
 0x13d   : > { %1440 = vmatprep.subr.bf16.mxu1 %v1439_v60 }
 0x13e   : > { %1410 = vmatpush3.bf16.msra.mxu0 %v1407_v36  ;;  %v1111_v36 = vld [vmem:[%s1905_s3 + $0x150] sm:$0xff] }
 0x13f   : > { %1412 = vmatprep.subr.bf16.mxu0 %v1411_v39  ;;  %v1483_v38 = vpack.c.bf16 %v1112_v37, %v1111_v36 }
 0x140   : > { %1442 = vmatpush3.bf16.msra.mxu1 %v1439_v60 }
 0x141   : > { %1444 = vmatprep.subr.bf16.mxu1 %v1443_v63 }
 0x142   : > { %1414 = vmatpush3.bf16.msra.mxu0 %v1411_v39  ;;  %v1113_v39 = vld [vmem:[%s1905_s3 + $0x160] sm:$0xff] }
 0x143   : > { %1416 = vmatprep.subr.bf16.mxu0 %v1415_v42  ;;  %v1487_v41 = vpack.c.bf16 %v1114_v40, %v1113_v39 }
 0x144   : > { %1446 = vmatpush3.bf16.msra.mxu1 %v1443_v63 }
 0x145   : > { %1448 = vmatprep.subr.bf16.mxu1 %v1447_v2 }
 0x146   : > { %1418 = vmatpush3.bf16.msra.mxu0 %v1415_v42  ;;  %v1115_v42 = vld [vmem:[%s1905_s3 + $0x170] sm:$0xff] }
 0x147   : > { %1420 = vmatprep.subr.bf16.mxu0 %v1419_v45  ;;  %v1491_v44 = vpack.c.bf16 %v1116_v43, %v1115_v42 }
 0x148   : > { %1450 = vmatpush3.bf16.msra.mxu1 %v1447_v2 }
 0x149   : > { %1452 = vmatprep.subr.bf16.mxu1 %v1451_v5 }
 0x14a   : > { %1422 = vmatpush3.bf16.msra.mxu0 %v1419_v45 }
 0x14b   : > { %1424 = vmatprep.subr.bf16.mxu0 %v1423_v48 }
 0x14c   : > { %1454 = vmatpush3.bf16.msra.mxu1 %v1451_v5 }
 0x14d   : > { %1456 = vmatprep.subr.bf16.mxu1 %v1455_v8 }
 0x14e   : > { %1426 = vmatpush3.bf16.msra.mxu0 %v1423_v48 }
 0x14f   : > { %1460 = vmatprep.subr.bf16.mxu0 %v1736_v20 }
 0x150   : > { %1458 = vmatpush3.bf16.msra.mxu1 %v1455_v8 }
 0x151   : > { %1464 = vmatprep.subr.bf16.mxu1 %v1463_v11 }
 0x204   : > { %v1243_v14 = vpop.f32.mrb[0].mxu1  ;;  %v1233_v15 = vpop.f32.mrb[2].mxu0 }
 0x205   : > { %v551_v16 = vpop.f32.mrb[1].mxu1  ;;  %v433_v17 = vpop.f32.mrb[3].mxu0 }
 0x206   : > { %1279 = vmatprep.mubr.f32.mxu0 %v551_v16  ;;  %1317 = vmatprep.mubr.f32.mxu1 %v433_v17 }
 0x207   : > { %1280 = vmatmul.mubr.f32.vlgmr.msra.gmra.mrb[6].mxu0 %v1243_v14  ;;  %1318 = vmatmul.mubr.f32.vlgmr.msra.gmra.mrb[4].mxu1 %v1233_v15 }
 0x208   : > { %1462 = vmatpush3.bf16.msra.mxu0 %v1736_v20  ;;  %v1246_v22 = vpop.f32.mrb[2].mxu1  ;;  %1466 = vmatpush3.bf16.msra.mxu1 %v1463_v11  ;;  %v1236_v23 = vpop.f32.mrb[4].mxu0  ;;  %v759_v20 = vld [vmem:[#allocation4 + $0x48] sm:$0xff] }
 0x209   : > { %v561_v24 = vpop.f32.mrb[3].mxu1  ;;  %1468 = vmatprep.subr.bf16.mxu1 %v1467_v18  ;;  %v443_v27 = vpop.f32.mrb[5].mxu0 }
 0x20a   : > { %1282 = vmatprep.mubr.f32.mxu0 %v561_v24  ;;  %1320 = vmatprep.mubr.f32.mxu1 %v443_v27 }
 0x20b   : > { %1283 = vmatmul.mubr.f32.gmra.mrb[8].mxu0 %v1246_v22  ;;  %1321 = vmatmul.mubr.f32.gmra.mrb[6].mxu1 %v1236_v23 }
 0x20c   : > { %1327 = vmatprep.mubr.msk.f32.mxu0 %vm354_vm1, %v758_v25  ;;  %1470 = vmatpush3.bf16.msra.mxu1 %v1467_v18 }
 0x20d   : > { %1472 = vmatprep.subr.bf16.mxu1 %v1471_v26 }
 0x20f   : > { %1328 = vmatmul.mubr.msk.f32.vlgmr.msra.gmra.mrb[10].mxu0 %vm354_vm1, %v759_v20 }
 0x210   : > { %1330 = vmatprep.mubr.msk.f32.mxu0 %vm354_vm1, %v760_v30  ;;  %1474 = vmatpush3.bf16.msra.mxu1 %v1471_v26 }
 0x211   : > { %1476 = vmatprep.subr.bf16.mxu1 %v1475_v31 }
 0x213   : > { %1331 = vmatmul.mubr.msk.f32.gmra.mrb[12].mxu0 %vm354_vm1, %v761_v34 }
 0x214   : > { %1478 = vmatpush3.bf16.msra.mxu1 %v1475_v31 }
 0x215   : > { %1480 = vmatprep.subr.bf16.mxu1 %v1479_v35 }
 0x218   : > { %1482 = vmatpush3.bf16.msra.mxu1 %v1479_v35 }
 0x219   : > { %1484 = vmatprep.subr.bf16.mxu1 %v1483_v38 }
 0x21c   : > { %1486 = vmatpush3.bf16.msra.mxu1 %v1483_v38 }
 0x21d   : > { %1488 = vmatprep.subr.bf16.mxu1 %v1487_v41 }
 0x220   : > { %1490 = vmatpush3.bf16.msra.mxu1 %v1487_v41 }
 0x221   : > { %1492 = vmatprep.subr.bf16.mxu1 %v1491_v44 }
 0x224   : > { %1494 = vmatpush3.bf16.msra.mxu1 %v1491_v44 }
 0x2da   : > { %v1281_v45 = vpop.f32.mrb[6].mxu0 }
 0x2db   : > { %v653_v46 = vpop.f32.mrb[7].mxu0 }
 0x2de   : > { %v1284_v47 = vpop.f32.mrb[8].mxu0 }
 0x2df   : > { %v663_v48 = vpop.f32.mrb[9].mxu0 }
 0x2e2   : > { %v1329_v49 = vpop.f32.mrb[10].mxu0 }
 0x2e3   : > { %v840_v50 = vpop.f32.mrb[11].mxu0 }
 0x2e4   : > { %1365 = vmatprep.mubr.f32.mxu1 %v840_v50 }
 0x2e5   : > { %1366 = vmatmul.mubr.f32.vlgmr.msra.gmra.mrb[4].mxu1 %v1329_v49 }
 0x2e6   : > { %v1332_v51 = vpop.f32.mrb[12].mxu0 }
 0x2e7   : > { %v850_v52 = vpop.f32.mrb[13].mxu0 }
 0x2e8   : > { %1368 = vmatprep.mubr.f32.mxu1 %v850_v52 }
 0x2e9   : > { %1369 = vmatmul.mubr.f32.gmra.mrb[6].mxu1 %v1332_v51 }
 0x3b8   : > { %v1367_v53 = vpop.f32.mrb[4].mxu1 }
 0x3b9   : > { %v1495_v54 = vadd.f32 %v1367_v53, %v1281_v45  ;;  %v942_v56 = vpop.f32.mrb[5].mxu1 }
 0x3ba   : > { %v1496_v57 = vadd.f32 %v942_v56, %v653_v46 }
 0x3bb   : > { %v973_v60 = vadd.f32 %v1495_v54, %v1117_v55 }
 0x3bc   : > { %v972_v58 = vadd.f32 %v1496_v57, %v1117_v55  ;;  %v1370_v59 = vpop.f32.mrb[6].mxu1 }
 0x3bd   : > { %v1497_v61 = vadd.f32 %v1370_v59, %v1284_v47  ;;  %v952_v62 = vpop.f32.mrb[7].mxu1  ;;  %977 = vst [vmem:[%s256_s15 + $0x8] sm:$0xff] %v973_v60 }
 0x3be   : > { %976 = vst [vmem:[%s256_s15] sm:$0xff] %v972_v58  ;;  %v1498_v63 = vadd.f32 %v952_v62, %v663_v48 }
 0x3bf   : > { %v975_v1 = vadd.f32 %v1497_v61, %v1117_v55 }
 0x3c0   : > { %v974_v0 = vadd.f32 %v1498_v63, %v1117_v55 }
 0x3c1   : > { %979 = vst [vmem:[%s256_s15 + $0x18] sm:$0xff] %v975_v1 }
 0x3c2   : > { %978 = vst [vmem:[%s256_s15 + $0x10] sm:$0xff] %v974_v0 }
 0x3c3 PF: > { %s17_s18 = sadd.s32 1, %s1604_s18  }
 0x3c4   : > { %p14_p10 = scmp.ge.s32.totalorder %s17_s18, 4  }
 0x3c6   :  { %16 = sbr.rel (!%p14_p10) target bundleno = 2 (0x2), region = 83 }
 0x3cd   :  { %1002 = vsyncpa [#allocation3], 1 }
 0x3ce   :  { %1004 = vsyncpa [#allocation3 + $0x1], 1 }
 0x3cf   :  { %1005 = vsyncpa [#allocation5], 1 }

</bundles_post_ra>
